<compile_context>
chip_gen: v7x
topology: tpu7x:2x2x1
jax: 0.10.0
libtpu: 0.0.40
codegen_flags: <defaults>
</compile_context>

<pallas_src>
import functools

import jax
import jax.numpy as jnp
from jax.experimental import pallas as pl
from jax.experimental.pallas import tpu as pltpu


def _cdiv(a, b):
    return (a + b - 1) // b


def _round_up(x, m):
    return ((x + m - 1) // m) * m


def _default_num_splits():
    """One grid 'split' per TensorCore: 1 on v5e/v6e, 2 on v7x."""
    try:
        kind = jax.devices()[0].device_kind.lower()
    except Exception:
        return 1
    return 2 if "v7" in kind else 1


def _loss_kernel(scores_ref, locs_ref, gt_ref, labels_ref, out_ref, acc_ref, *,
                 n_valid, inv_n, inv_4n):
    """One (tile_n, ...) slab of RoI samples; samples sit on the sublane axis."""
    p = pl.program_id(0)
    t = pl.program_id(1)
    tps = pl.num_programs(1)

    @pl.when(t == 0)
    def _init():
        acc_ref[...] = jnp.zeros_like(acc_ref)

    scores = scores_ref[...].astype(jnp.float32)     # (T, C)
    locs = locs_ref[...].astype(jnp.float32)         # (T, 4C)
    gt = gt_ref[...].astype(jnp.float32)              # (T, 4)
    labels = labels_ref[...]                           # (T, 1) int32
    T, C = scores.shape

    # ---- in-kernel validity mask (handles the ragged / OOB tail of the block) ----
    base = (p * tps + t) * T
    row = base + jax.lax.broadcasted_iota(jnp.int32, (T, 1), 0)
    valid = row < n_valid                               # (T, 1) bool
    valid_f = valid.astype(jnp.float32)

    # ---- softmax cross-entropy along the class (lane) axis ----
    s = jnp.where(valid, scores, 0.0)                   # keep OOB garbage finite
    m = jnp.max(s, axis=1, keepdims=True)                # (T, 1)
    shifted = s - m                                       # (T, C)
    lse = jnp.log(jnp.sum(jnp.exp(shifted), axis=1, keepdims=True))
    cls_iota = jax.lax.broadcasted_iota(jnp.int32, (T, C), 1)
    onehot = cls_iota == labels                           # (T, C) bool
    correct = jnp.sum(jnp.where(onehot, shifted, 0.0), axis=1, keepdims=True)
    ce_row = lse - correct                                # (T, 1)

    # ---- SmoothL1 on the gt-class 4-vector, computed in the flat (T, 4C) slab ----
    lane4 = jax.lax.broadcasted_iota(jnp.int32, (T, 4 * C), 1)
    group = lane4 >> 2                                    # class index of each lane
    comp = lane4 & 3                                      # box component 0..3
    sel = jnp.logical_and(group == labels, valid)         # (T, 4C) bool
    gt_b = jnp.where(comp == 0, gt[:, 0:1],
                     jnp.where(comp == 1, gt[:, 1:2],
                               jnp.where(comp == 2, gt[:, 2:3], gt[:, 3:4])))
    d = jnp.where(sel, locs - gt_b, 0.0)                  # unselected -> 0 -> sl1 == 0
    ad = jnp.abs(d)
    sl1 = jnp.where(ad < 1.0, 0.5 * d * d, ad - 0.5)      # (T, 4C)
    sl1_row = jnp.sum(sl1, axis=1, keepdims=True)          # (T, 1)

    # Per-row contributions, already scaled; one VPU add per step.
    acc_ref[...] += valid_f * (ce_row * inv_n + sl1_row * inv_4n)

    @pl.when(t == tps - 1)
    def _finalize():
        total = jnp.sum(acc_ref[...])
        # Lane-dense (8, 128) write-out; wrapper reads element [0, 0] per split.
        out_ref[...] = total * jnp.ones(out_ref.shape, jnp.float32)


def faster_rcnn_loss(roi_cls_locs, roi_scores, gt_roi_locs, gt_roi_labels,
                     *, tile_n=None, num_splits=None):
    """Fused CE + SmoothL1 loss over RoI-head outputs (matches the PyTorch criteria)."""
    N, C = roi_scores.shape
    assert roi_cls_locs.shape == (N, 4 * C)
    assert gt_roi_locs.shape == (N, 4)
    assert gt_roi_labels.shape == (N,)

    # TODO(synk): for very large class counts (C ~ 81) a pre-gather of the gt-class
    # 4-vector would shrink the dominant (N, 4C) stream by ~C; dense select kept
    # here because it is the right trade for the typical C <= 21 heads.

    if num_splits is None:
        num_splits = _default_num_splits()
    splits = max(1, min(int(num_splits), _cdiv(N, 8)))

    if tile_n is None:
        # Largest sublane tile that covers the per-split work; cap keeps the
        # double-buffered locs slab to a couple of MiB even at C = 81.
        tile_n = min(_round_up(_cdiv(N, splits), 8), 1024)
    tile_n = max(8, _round_up(int(tile_n), 8))

    tiles_total = _cdiv(N, tile_n)
    if splits > 1 and tiles_total % splits != 0:
        splits = 1            # never issue a fully out-of-bounds padded tile
    tiles_per_split = tiles_total // splits

    labels2 = gt_roi_labels.astype(jnp.int32).reshape(N, 1)   # tiny; only wrapper op

    kernel = functools.partial(
        _loss_kernel,
        n_valid=N,
        inv_n=1.0 / float(N),
        inv_4n=1.0 / (4.0 * float(N)))

    row_map = lambda p, t: (p * tiles_per_split + t, 0)

    out = pl.pallas_call(
        kernel,
        out_shape=jax.ShapeDtypeStruct((splits, 8, 128), jnp.float32),
        grid=(splits, tiles_per_split),
        in_specs=[
            pl.BlockSpec((tile_n, C), row_map),          # scores   (T, C), native dtype
            pl.BlockSpec((tile_n, 4 * C), row_map),      # cls_locs (T, 4C), native dtype
            pl.BlockSpec((tile_n, 4), row_map),          # gt locs  (T, 4), native dtype
            pl.BlockSpec((tile_n, 1), row_map),          # labels   (T, 1) int32
        ],
        out_specs=pl.BlockSpec((1, 8, 128), lambda p, t: (p, 0, 0)),
        scratch_shapes=[pltpu.VMEM((tile_n, 1), jnp.float32)],   # per-row accumulator
        compiler_params=pltpu.CompilerParams(
            dimension_semantics=("parallel", "arbitrary")),
    )(roi_scores, roi_cls_locs, gt_roi_locs, labels2)

    # Sum per-split partial losses (each already scaled by 1/N and 1/(4N)).
    return jnp.sum(out[:, 0, 0])


def _reference(roi_cls_locs, roi_scores, gt_roi_locs, gt_roi_labels):
    # pure-JAX reference mirroring the PyTorch CrossEntropyLoss + SmoothL1Loss
    N = roi_scores.shape[0]
    logp = jax.nn.log_softmax(roi_scores, axis=-1)
    ce = -jnp.mean(logp[jnp.arange(N), gt_roi_labels])
    roi_loc = roi_cls_locs.reshape(N, -1, 4)[jnp.arange(N), gt_roi_labels]
    d = roi_loc - gt_roi_locs
    ad = jnp.abs(d)
    sl1 = jnp.where(ad < 1.0, 0.5 * d * d, ad - 0.5)
    return ce + jnp.mean(sl1)


if __name__ == "__main__":
    # TODO(synk): ResNet101 backbone (torch.hub pretrained), RPN proposal/NMS and the
    # dynamic-shape RoIAlign of the spec are host-side / data-dependent; this kernel
    # implements the RoI-head loss criteria over the head outputs.

    # --- small case (single tile, single split) ---
    N_SAMPLE, N_CLASS = 16, 8
    key = jax.random.PRNGKey(0)
    k1, k2, k3, k4 = jax.random.split(key, 4)
    roi_cls_locs = jax.random.normal(k1, (N_SAMPLE, N_CLASS * 4), dtype=jnp.float32)
    roi_scores = jax.random.normal(k2, (N_SAMPLE, N_CLASS), dtype=jnp.float32)
    gt_roi_locs = jax.random.normal(k3, (N_SAMPLE, 4), dtype=jnp.float32)
    gt_roi_labels = jax.random.randint(k4, (N_SAMPLE,), 0, N_CLASS, dtype=jnp.int32)

    loss = faster_rcnn_loss(roi_cls_locs, roi_scores, gt_roi_locs, gt_roi_labels)
    jax.block_until_ready(loss)
    ref = _reference(roi_cls_locs, roi_scores, gt_roi_locs, gt_roi_labels)
    assert jnp.allclose(loss, ref, rtol=1e-5, atol=1e-5), (loss, ref)

    # --- mid-size case (typical RoI batch, 21-class head, single grid step) ---
    N2, C2 = 640, 21
    k5, k6, k7, k8 = jax.random.split(jax.random.PRNGKey(1), 4)
    rcl2 = jax.random.normal(k5, (N2, C2 * 4), dtype=jnp.float32)
    rs2 = jax.random.normal(k6, (N2, C2), dtype=jnp.float32)
    gl2 = jax.random.normal(k7, (N2, 4), dtype=jnp.float32)
    lab2 = jax.random.randint(k8, (N2,), 0, C2, dtype=jnp.int32)

    loss2 = faster_rcnn_loss(rcl2, rs2, gl2, lab2)
    jax.block_until_ready(loss2)
    ref2 = _reference(rcl2, rs2, gl2, lab2)
    assert jnp.allclose(loss2, ref2, rtol=1e-4, atol=1e-4), (loss2, ref2)

    # --- bf16 inputs passed straight through, ragged N (not a multiple of 8) ---
    N3, C3 = 200, 12
    k9, k10, k11, k12 = jax.random.split(jax.random.PRNGKey(2), 4)
    rcl3 = jax.random.normal(k9, (N3, C3 * 4), dtype=jnp.bfloat16)
    rs3 = jax.random.normal(k10, (N3, C3), dtype=jnp.bfloat16)
    gl3 = jax.random.normal(k11, (N3, 4), dtype=jnp.bfloat16)
    lab3 = jax.random.randint(k12, (N3,), 0, C3, dtype=jnp.int32)

    loss3 = faster_rcnn_loss(rcl3, rs3, gl3, lab3)
    jax.block_until_ready(loss3)
    ref3 = _reference(rcl3.astype(jnp.float32), rs3.astype(jnp.float32),
                      gl3.astype(jnp.float32), lab3)
    assert jnp.allclose(loss3, ref3, rtol=1e-4, atol=1e-4), (loss3, ref3)

    print("KERNEL_OK")
</pallas_src>

<mosaic_0001>
module attributes {stable_mosaic.version = 11 : i64} {
  func.func @_loss_kernel(%arg0: i32, %arg1: i32, %arg2: memref<16x8xf32, #tpu.memory_space<vmem>>, %arg3: memref<16x32xf32, #tpu.memory_space<vmem>>, %arg4: memref<16x4xf32, #tpu.memory_space<vmem>>, %arg5: memref<16x1xi32, #tpu.memory_space<vmem>>, %arg6: memref<1x8x128xf32, #tpu.memory_space<vmem>>, %arg7: memref<16x1xf32, #tpu.memory_space<vmem>>) attributes {dimension_semantics = [#tpu.dimension_semantics<parallel>, #tpu.dimension_semantics<arbitrary>], iteration_bounds = array<i64: 1, 1>, scalar_prefetch = 0 : i64, scratch_operands = 1 : i64, tpu.core_type = #tpu.core_type<tc>, window_params = [{transform_indices = @transform_0, window_bounds = array<i64: 16, 8>}, {transform_indices = @transform_1, window_bounds = array<i64: 16, 32>}, {transform_indices = @transform_2, window_bounds = array<i64: 16, 4>}, {transform_indices = @transform_3, window_bounds = array<i64: 16, 1>}, {transform_indices = @transform_4, window_bounds = array<i64: 1, 8, 128>}]} {
    %c0_i32 = arith.constant 0 : i32
    %0 = arith.cmpi eq, %arg1, %c0_i32 : i32
    %1 = arith.extui %0 : i1 to i32
    %c0_i32_0 = arith.constant 0 : i32
    %2 = arith.cmpi ne, %1, %c0_i32_0 : i32
    scf.if %2 {
      %cst_29 = arith.constant 0.000000e+00 : f32
      %93 = vector.broadcast %cst_29 : f32 to vector<16x1xf32>
      %c0_30 = arith.constant 0 : index
      %c0_31 = arith.constant 0 : index
      %94 = vector.load %arg7[%c0_30, %c0_31] : memref<16x1xf32, #tpu.memory_space<vmem>>, vector<16x1xf32>
      tpu.vector_store %arg7[%c0_30, %c0_31], %93 {strides = array<i32>} : memref<16x1xf32, #tpu.memory_space<vmem>>, vector<16x1xf32>,
    } else {
    }
    %c0 = arith.constant 0 : index
    %c0_1 = arith.constant 0 : index
    %3 = vector.load %arg2[%c0, %c0_1] : memref<16x8xf32, #tpu.memory_space<vmem>>, vector<16x8xf32>
    %c0_2 = arith.constant 0 : index
    %c0_3 = arith.constant 0 : index
    %4 = vector.load %arg3[%c0_2, %c0_3] : memref<16x32xf32, #tpu.memory_space<vmem>>, vector<16x32xf32>
    %c0_4 = arith.constant 0 : index
    %c0_5 = arith.constant 0 : index
    %5 = vector.load %arg4[%c0_4, %c0_5] : memref<16x4xf32, #tpu.memory_space<vmem>>, vector<16x4xf32>
    %c0_6 = arith.constant 0 : index
    %c0_7 = arith.constant 0 : index
    %6 = vector.load %arg5[%c0_6, %c0_7] : memref<16x1xi32, #tpu.memory_space<vmem>>, vector<16x1xi32>
    %c1_i32 = arith.constant 1 : i32
    %7 = arith.muli %arg0, %c1_i32 : i32
    %8 = arith.addi %7, %arg1 : i32
    %c16_i32 = arith.constant 16 : i32
    %9 = arith.muli %8, %c16_i32 : i32
    %10 = tpu.iota {dimensions = array<i32: 0>} : vector<16x1xi32>
    %11 = vector.broadcast %9 : i32 to vector<16x1xi32>
    %12 = arith.addi %11, %10 : vector<16x1xi32>
    %c16_i32_8 = arith.constant 16 : i32
    %13 = vector.broadcast %c16_i32_8 : i32 to vector<16x1xi32>
    %14 = arith.cmpi slt, %12, %13 : vector<16x1xi32>
    %15 = arith.extui %14 : vector<16x1xi1> to vector<16x1xi32>
    %16 = arith.sitofp %15 : vector<16x1xi32> to vector<16x1xf32>
    %cst = arith.constant 0.000000e+00 : f32
    %17 = vector.shape_cast %14 : vector<16x1xi1> to vector<16x1xi1>
    %18 = vector.broadcast %17 : vector<16x1xi1> to vector<16x8xi1>
    %19 = vector.broadcast %cst : f32 to vector<16x8xf32>
    %20 = arith.select %18, %3, %19 : vector<16x8xi1>, vector<16x8xf32>
    %cst_9 = arith.constant dense<0xFF800000> : vector<16xf32>
    %21 = vector.multi_reduction <maximumf>, %20, %cst_9 [1] : vector<16x8xf32> to vector<16xf32>
    %22 = vector.shape_cast %21 : vector<16xf32> to vector<16x1xf32>
    %23 = vector.broadcast %22 : vector<16x1xf32> to vector<16x8xf32>
    %24 = arith.subf %20, %23 : vector<16x8xf32>
    %25 = math.exp %24 : vector<16x8xf32>
    %cst_10 = arith.constant dense<0.000000e+00> : vector<16xf32>
    %26 = vector.multi_reduction <add>, %25, %cst_10 [1] : vector<16x8xf32> to vector<16xf32>
    %27 = vector.shape_cast %26 : vector<16xf32> to vector<16x1xf32>
    %28 = math.log %27 : vector<16x1xf32>
    %29 = tpu.iota {dimensions = array<i32: 1>} : vector<16x8xi32>
    %30 = vector.broadcast %6 : vector<16x1xi32> to vector<16x8xi32>
    %31 = arith.cmpi eq, %29, %30 : vector<16x8xi32>
    %cst_11 = arith.constant 0.000000e+00 : f32
    %32 = vector.broadcast %cst_11 : f32 to vector<16x8xf32>
    %33 = arith.select %31, %24, %32 : vector<16x8xi1>, vector<16x8xf32>
    %cst_12 = arith.constant dense<0.000000e+00> : vector<16xf32>
    %34 = vector.multi_reduction <add>, %33, %cst_12 [1] : vector<16x8xf32> to vector<16xf32>
    %35 = vector.shape_cast %34 : vector<16xf32> to vector<16x1xf32>
    %36 = arith.subf %28, %35 : vector<16x1xf32>
    %37 = tpu.iota {dimensions = array<i32: 1>} : vector<16x32xi32>
    %c2_i32 = arith.constant 2 : i32
    %38 = vector.broadcast %c2_i32 : i32 to vector<16x32xi32>
    %39 = arith.shrsi %37, %38 : vector<16x32xi32>
    %c3_i32 = arith.constant 3 : i32
    %40 = vector.broadcast %c3_i32 : i32 to vector<16x32xi32>
    %41 = arith.andi %37, %40 : vector<16x32xi32>
    %42 = vector.broadcast %6 : vector<16x1xi32> to vector<16x32xi32>
    %43 = arith.cmpi eq, %39, %42 : vector<16x32xi32>
    %44 = vector.broadcast %14 : vector<16x1xi1> to vector<16x32xi1>
    %45 = arith.andi %43, %44 : vector<16x32xi1>
    %c0_i32_13 = arith.constant 0 : i32
    %46 = vector.broadcast %c0_i32_13 : i32 to vector<16x32xi32>
    %47 = arith.cmpi eq, %41, %46 : vector<16x32xi32>
    %48 = vector.extract_strided_slice %5 {offsets = [0, 0], sizes = [16, 1], strides = [1, 1]} : vector<16x4xf32> to vector<16x1xf32>
    %c1_i32_14 = arith.constant 1 : i32
    %49 = vector.broadcast %c1_i32_14 : i32 to vector<16x32xi32>
    %50 = arith.cmpi eq, %41, %49 : vector<16x32xi32>
    %51 = vector.extract_strided_slice %5 {offsets = [0, 1], sizes = [16, 1], strides = [1, 1]} : vector<16x4xf32> to vector<16x1xf32>
    %c2_i32_15 = arith.constant 2 : i32
    %52 = vector.broadcast %c2_i32_15 : i32 to vector<16x32xi32>
    %53 = arith.cmpi eq, %41, %52 : vector<16x32xi32>
    %54 = vector.extract_strided_slice %5 {offsets = [0, 2], sizes = [16, 1], strides = [1, 1]} : vector<16x4xf32> to vector<16x1xf32>
    %55 = vector.extract_strided_slice %5 {offsets = [0, 3], sizes = [16, 1], strides = [1, 1]} : vector<16x4xf32> to vector<16x1xf32>
    %56 = vector.shape_cast %54 : vector<16x1xf32> to vector<16x1xf32>
    %57 = vector.broadcast %56 : vector<16x1xf32> to vector<16x32xf32>
    %58 = vector.shape_cast %55 : vector<16x1xf32> to vector<16x1xf32>
    %59 = vector.broadcast %58 : vector<16x1xf32> to vector<16x32xf32>
    %60 = arith.select %53, %57, %59 : vector<16x32xi1>, vector<16x32xf32>
    %61 = vector.shape_cast %51 : vector<16x1xf32> to vector<16x1xf32>
    %62 = vector.broadcast %61 : vector<16x1xf32> to vector<16x32xf32>
    %63 = arith.select %50, %62, %60 : vector<16x32xi1>, vector<16x32xf32>
    %64 = vector.shape_cast %48 : vector<16x1xf32> to vector<16x1xf32>
    %65 = vector.broadcast %64 : vector<16x1xf32> to vector<16x32xf32>
    %66 = arith.select %47, %65, %63 : vector<16x32xi1>, vector<16x32xf32>
    %67 = arith.subf %4, %66 : vector<16x32xf32>
    %cst_16 = arith.constant 0.000000e+00 : f32
    %68 = vector.broadcast %cst_16 : f32 to vector<16x32xf32>
    %69 = arith.select %45, %67, %68 : vector<16x32xi1>, vector<16x32xf32>
    %70 = math.absf %69 : vector<16x32xf32>
    %cst_17 = arith.constant 1.000000e+00 : f32
    %71 = vector.broadcast %cst_17 : f32 to vector<16x32xf32>
    %72 = arith.cmpf olt, %70, %71 : vector<16x32xf32>
    %cst_18 = arith.constant 5.000000e-01 : f32
    %73 = vector.broadcast %cst_18 : f32 to vector<16x32xf32>
    %74 = arith.mulf %73, %69 : vector<16x32xf32>
    %75 = arith.mulf %74, %69 : vector<16x32xf32>
    %cst_19 = arith.constant 5.000000e-01 : f32
    %76 = vector.broadcast %cst_19 : f32 to vector<16x32xf32>
    %77 = arith.subf %70, %76 : vector<16x32xf32>
    %78 = arith.select %72, %75, %77 : vector<16x32xi1>, vector<16x32xf32>
    %cst_20 = arith.constant dense<0.000000e+00> : vector<16xf32>
    %79 = vector.multi_reduction <add>, %78, %cst_20 [1] : vector<16x32xf32> to vector<16xf32>
    %80 = vector.shape_cast %79 : vector<16xf32> to vector<16x1xf32>
    %c0_21 = arith.constant 0 : index
    %c0_22 = arith.constant 0 : index
    %81 = vector.load %arg7[%c0_21, %c0_22] : memref<16x1xf32, #tpu.memory_space<vmem>>, vector<16x1xf32>
    %cst_23 = arith.constant 6.250000e-02 : f32
    %82 = vector.broadcast %cst_23 : f32 to vector<16x1xf32>
    %83 = arith.mulf %36, %82 : vector<16x1xf32>
    %cst_24 = arith.constant 1.562500e-02 : f32
    %84 = vector.broadcast %cst_24 : f32 to vector<16x1xf32>
    %85 = arith.mulf %80, %84 : vector<16x1xf32>
    %86 = arith.addf %83, %85 : vector<16x1xf32>
    %87 = arith.mulf %16, %86 : vector<16x1xf32>
    %88 = arith.addf %81, %87 : vector<16x1xf32>
    %c0_25 = arith.constant 0 : index
    %c0_26 = arith.constant 0 : index
    %89 = vector.load %arg7[%c0_25, %c0_26] : memref<16x1xf32, #tpu.memory_space<vmem>>, vector<16x1xf32>
    tpu.vector_store %arg7[%c0_25, %c0_26], %88 {strides = array<i32>} : memref<16x1xf32, #tpu.memory_space<vmem>>, vector<16x1xf32>,
    %c0_i32_27 = arith.constant 0 : i32
    %90 = arith.cmpi eq, %arg1, %c0_i32_27 : i32
    %91 = arith.extui %90 : i1 to i32
    %c0_i32_28 = arith.constant 0 : i32
    %92 = arith.cmpi ne, %91, %c0_i32_28 : i32
    scf.if %92 {
      %c0_29 = arith.constant 0 : index
      %c0_30 = arith.constant 0 : index
      %93 = vector.load %arg7[%c0_29, %c0_30] : memref<16x1xf32, #tpu.memory_space<vmem>>, vector<16x1xf32>
      %94 = vector.shape_cast %93 : vector<16x1xf32> to vector<1x16x1xf32>
      %cst_31 = arith.constant dense<0.000000e+00> : vector<1xf32>
      %95 = vector.multi_reduction <add>, %94, %cst_31 [1, 2] : vector<1x16x1xf32> to vector<1xf32>
      %96 = vector.shape_cast %95 : vector<1xf32> to vector<1x1x1xf32>
      %97 = vector.extract %96[0, 0, 0] : f32 from vector<1x1x1xf32>
      %cst_32 = arith.constant 1.000000e+00 : f32
      %98 = vector.broadcast %cst_32 : f32 to vector<1x8x128xf32>
      %99 = vector.broadcast %97 : f32 to vector<1x8x128xf32>
      %100 = arith.mulf %99, %98 : vector<1x8x128xf32>
      %c0_33 = arith.constant 0 : index
      %c0_34 = arith.constant 0 : index
      %c0_35 = arith.constant 0 : index
      %101 = vector.load %arg6[%c0_33, %c0_34, %c0_35] : memref<1x8x128xf32, #tpu.memory_space<vmem>>, vector<1x8x128xf32>
      tpu.vector_store %arg6[%c0_33, %c0_34, %c0_35], %100 {strides = array<i32>} : memref<1x8x128xf32, #tpu.memory_space<vmem>>, vector<1x8x128xf32>,
    } else {
    }
    return
  }
  func.func @transform_0(%arg0: i32, %arg1: i32) -> (i32, i32) {
    %c1_i32 = arith.constant 1 : i32
    %0 = arith.muli %arg0, %c1_i32 : i32
    %1 = arith.addi %0, %arg1 : i32
    %c0_i32 = arith.constant 0 : i32
    %c0_i32_0 = arith.constant 0 : i32
    return %1, %c0_i32 : i32, i32
  }
  func.func @transform_1(%arg0: i32, %arg1: i32) -> (i32, i32) {
    %c1_i32 = arith.constant 1 : i32
    %0 = arith.muli %arg0, %c1_i32 : i32
    %1 = arith.addi %0, %arg1 : i32
    %c0_i32 = arith.constant 0 : i32
    %c0_i32_0 = arith.constant 0 : i32
    return %1, %c0_i32 : i32, i32
  }
  func.func @transform_2(%arg0: i32, %arg1: i32) -> (i32, i32) {
    %c1_i32 = arith.constant 1 : i32
    %0 = arith.muli %arg0, %c1_i32 : i32
    %1 = arith.addi %0, %arg1 : i32
    %c0_i32 = arith.constant 0 : i32
    %c0_i32_0 = arith.constant 0 : i32
    return %1, %c0_i32 : i32, i32
  }
  func.func @transform_3(%arg0: i32, %arg1: i32) -> (i32, i32) {
    %c1_i32 = arith.constant 1 : i32
    %0 = arith.muli %arg0, %c1_i32 : i32
    %1 = arith.addi %0, %arg1 : i32
    %c0_i32 = arith.constant 0 : i32
    %c0_i32_0 = arith.constant 0 : i32
    return %1, %c0_i32 : i32, i32
  }
  func.func @transform_4(%arg0: i32, %arg1: i32) -> (i32, i32, i32) {
    %c0_i32 = arith.constant 0 : i32
    %c0_i32_0 = arith.constant 0 : i32
    %c0_i32_1 = arith.constant 0 : i32
    return %arg0, %c0_i32, %c0_i32_0 : i32, i32, i32
  }
}

</mosaic_0001>

<bundles_post_ra>
// kernel: tpu_custom_call.1
= control target key start
LH: loop header
LB: loop body
LE: loop exit
PB: predicated region body
PF: predicated region fallthrough
CT: control target
= control target key end

     0   :  { %vm139_vm0 = vcmask 64512   ;;  %v374_v2 = vmov 2   ;;  %v375_v5 = vmov 3   ;;  %s455_s0 = inlined_call_operand.vmem [shape: f32[16,8], index: 0, kind: input, shape index: {}]   ;;  %s456_s1 = inlined_call_operand.vmem [shape: f32[16,32], index: 1, kind: input, shape index: {}]   ;;  %s457_s2 = inlined_call_operand.vmem [shape: f32[16,4], index: 2, kind: input, shape index: {}]   ;;  %s458_s3 = inlined_call_operand.vmem [shape: s32[16,1], index: 3, kind: input, shape index: {}]   ;;  %s459_s4 = inlined_call_operand.hbm [shape: f32[1,8,128], index: 4, kind: output, shape index: {}]  }
   0x1   :  { %v117_v0 = vld [vmem:[%s457_s2] sm:$0xff]  ;;  %336 = vset.pattern.permute.xlu1 %v374_v2  ;;  %v114_v4 = vld [vmem:[%s455_s0 + $0x8] sm:$0xff]  ;;  %337 = vset.pattern.permute.xlu0 %v375_v5 }
   0x2   :  { %v113_v1 = vld [vmem:[%s455_s0] sm:$0xff]  ;;  %193 = vperm.xlu1 %336, %v117_v0  }
   0x3   :  { %v140_v3 = vsel %vm139_vm0, %v113_v1, -inf }
   0x4   :  { %141 = vmax.xlane.f32.xlu0 %v140_v3 }
   0x5   :  { %9 = vsyncpa [#allocation4], 0  ;;  %v118_v6 = vld [vmem:[%s457_s2 + $0x8] sm:$0xff]  ;;  %v143_v7 = vsel %vm139_vm0, %v114_v4, -inf  ;;  %v376_v8 = vmov 1   ;;  %v377_v9 = vmov 0   ;;  %v162_v15 = vlaneseq }
   0x6   :  { %198 = vperm.xlu1 %336, %v118_v6   ;;  %v119_v10 = vld [vmem:[%s458_s3] sm:$0xff]  ;;  %v120_v11 = vld [vmem:[%s458_s3 + $0x8] sm:$0xff]  ;;  %vm247_vm9 = vcmask 261120   ;;  %vm110_vm11 = vcmask 7168  }
   0x7   :  { %v163_v20 = vand.u32 127, %v162_v15  ;;  %v115_v30 = vld [vmem:[%s456_s1] sm:$0xff]  ;;  %v116_v40 = vld [vmem:[%s456_s1 + $0x8] sm:$0xff]  ;;  %s379_s1 = smov [#allocation3]  }
   0x8   :  { %144 = vmax.xlane.f32.xlu0 %v143_v7  ;;  %s294_s28 = sshll.u32 %s379_s1, 4  ;;  %s295_s28 = int_to_ptr.vmem [resolvable:$true] %s294_s28 }
   0x9   :  { %v183_v25 = vand.u32 3, %v163_v20  ;;  %v182_v32 = vshra.s32 %v163_v20, 2  ;;  %s350_s30 = scalar_lea.vmem %s295_s28, 128  ;;  %p355_p1 = scmp.lt.s32.totalorder %s295_s28, %s295_s28 }
   0xa   :  { %338 = vset.pattern.permute.xlu1 %v375_v5  ;;  %p351_p0 = scmp.ne.s32.totalorder %s295_s28, %s350_s30  ;;  %p356_p2 = scmp.lt.s32.totalorder %s350_s30, %s350_s30 }
   0xb   :  { %206 = vperm.xlu1 %338, %v118_v6   ;;  %vm190_vm1 = vcmp.eq.s32.totalorder %v183_v25, 2  ;;  %vm188_vm2 = vcmp.eq.s32.totalorder %v183_v25, 0  ;;  %vm189_vm3 = vcmp.eq.s32.totalorder %v183_v25, 1 }
   0xc   :  { %p357_p3 = por %p356_p2, %p355_p1 }
   0xe   :  { %p358_p4 = pnand %p357_p3, %p351_p0 }
   0xf   :  { %339 = vset.pattern.permute.xlu1 %v376_v8 }
  0x10   :  { %212 = vperm.xlu1 %339, %v117_v0  }
  0x14   :  { %216 = vperm.xlu1 %339, %v118_v6  }
  0x18   :  { %340 = vset.pattern.permute.xlu1 %v377_v9 }
  0x19   :  { %222 = vperm.xlu1 %340, %v117_v0  }
  0x1d   :  { %226 = vperm.xlu1 %340, %v118_v6  }
  0x1e   :  { %202 = vperm.xlu0 %337, %v117_v0   ;;  %v378_v0 = vmov 0.0  }
  0x1f   :  { %111 = vst.msk [vmem:[#allocation2] sm:$0xff] %vm110_vm11, %v378_v0  ;;  %112 = vst.msk [vmem:[#allocation2 + $0x8] sm:$0xff] %vm110_vm11, %v378_v0 }
  0x21   :  { %165 = vperm.xlu1 %340, %v119_v10  }
  0x22   :  { %341 = vset.pattern.permute.xlu0 %v377_v9 }
  0x25   :  { %168 = vperm.xlu1 %340, %v120_v11  }
  0x81   :  { %v194_v12 = vpop.permute.xlu1 %193 }
  0x85   :  { %v199_v13 = vpop.permute.xlu1 %198 }
  0x8a   :  { %v207_v14 = vpop.permute.xlu1 %206 }
  0x8b   :  { %v210_v35 = vsel %vm190_vm1, %v199_v13, %v207_v14  ;;  %v254_v13 = vld [vmem:[#allocation2] sm:$0xff] }
  0x8f   :  { %v213_v16 = vpop.permute.xlu1 %212 }
  0x91   :  { %v142_v17 = vpop.xlane.xlu0 %141 }
  0x92   :  { %v146_v18 = vsub.f32 %v113_v1, %v142_v17 }
  0x93   :  { %v217_v21 = vpop.permute.xlu1 %216 }
  0x94   :  { %v148_v19 = vmul.f32 1.442695, %v146_v18  ;;  %v220_v38 = vsel %vm189_vm3, %v217_v21, %v210_v35 }
  0x95   :  { %v145_v22 = vpop.xlane.xlu0 %144 }
  0x96   :  { %342 = vpow2.f32 %v148_v19  ;;  %v147_v23 = vsub.f32 %v114_v4, %v145_v22 }
  0x98   :  { %v150_v24 = vmul.f32 1.442695, %v147_v23  ;;  %v223_v26 = vpop.permute.xlu1 %222 }
  0x9a   :  { %344 = vpow2.f32 %v150_v24 }
  0x9c   :  { %v227_v29 = vpop.permute.xlu1 %226 }
  0x9d   :  { %v203_v27 = vpop.permute.xlu0 %202  ;;  %v230_v41 = vsel %vm188_vm2, %v227_v29, %v220_v38 }
  0x9e   :  { %v209_v28 = vsel %vm190_vm1, %v194_v12, %v203_v27  ;;  %v232_v49 = vsub.f32 %v116_v40, %v230_v41 }
  0x9f   :  { %v219_v31 = vsel %vm189_vm3, %v213_v16, %v209_v28 }
  0xa0   :  { %v343_v33 = vpop.eup %342  ;;  %v229_v34 = vsel %vm188_vm2, %v223_v26, %v219_v31  ;;  %v166_v39 = vpop.permute.xlu1 %165 }
  0xa1   :  { %v231_v36 = vsub.f32 %v115_v30, %v229_v34  ;;  %v152_v37 = vsel %vm139_vm0, %v343_v33, 0.0  ;;  %vm170_vm4 = vcmp.eq.s32.totalorder %v163_v20, %v166_v39  ;;  %vm184_vm5 = vcmp.eq.s32.totalorder %v182_v32, %v166_v39 }
  0xa2   :  { %153 = vadd.xlane.f32.xlu1 %v152_v37  ;;  %v172_v44 = vsel %vm170_vm4, %v146_v18, 0.0 }
  0xa3   :  { %v233_v43 = vsel %vm184_vm5, %v231_v36, 0.0  ;;  %v174_v47 = vsel %vm139_vm0, %v172_v44, 0.0 }
  0xa4   :  { %v345_v42 = vpop.eup %344  ;;  %v235_v45 = vand.u32 2147483647, %v233_v43  ;;  %v239_v46 = vmul.f32 0.5, %v233_v43  ;;  %v169_v50 = vpop.permute.xlu1 %168 }
  0xa5   :  { %v155_v48 = vsel %vm139_vm0, %v345_v42, 0.0  ;;  %vm171_vm6 = vcmp.eq.s32.totalorder %v163_v20, %v169_v50  ;;  %vm185_vm7 = vcmp.eq.s32.totalorder %v182_v32, %v169_v50  ;;  %v255_v20 = vld [vmem:[#allocation2 + $0x8] sm:$0xff] }
  0xa6   :  { %175 = vadd.xlane.f32.xlu1 %v174_v47  ;;  %156 = vadd.xlane.f32.xlu0 %v155_v48  ;;  %v241_v51 = vmul.f32 %v239_v46, %v233_v43  ;;  %vm237_vm8 = vcmp.lt.f32.partialorder %v235_v45, 1.0  ;;  %v234_v52 = vsel %vm185_vm7, %v232_v49, 0.0  ;;  %v173_v53 = vsel %vm171_vm6, %v147_v23, 0.0 }
  0xa7   :  { %v326_v54 = vadd.f32 -0.5, %v235_v45  ;;  %v236_v55 = vand.u32 2147483647, %v234_v52  ;;  %v240_v56 = vmul.f32 0.5, %v234_v52  ;;  %v177_v57 = vsel %vm139_vm0, %v173_v53, 0.0 }
  0xa9   :  { %v245_v58 = vsel %vm237_vm8, %v241_v51, %v326_v54  ;;  %v242_v59 = vmul.f32 %v240_v56, %v234_v52  ;;  %vm238_vm10 = vcmp.lt.f32.partialorder %v236_v55, 1.0  ;;  %v327_v60 = vadd.f32 -0.5, %v236_v55 }
  0xaa   :  { %178 = vadd.xlane.f32.xlu1 %v177_v57  ;;  %v248_v61 = vsel %vm247_vm9, %v245_v58, 0.0 }
  0xab   :  { %v246_v62 = vsel %vm238_vm10, %v242_v59, %v327_v60 }
  0xac   :  { %v251_v63 = vsel %vm247_vm9, %v246_v62, 0.0 }
  0xad   :  { %252 = vadd.xlane.f32.xlu0 %v251_v63 }
  0xae   :  { %249 = vadd.xlane.f32.xlu1 %v248_v61 }
 0x12f   :  { %v154_v1 = vpop.xlane.xlu1 %153 }
 0x130   :  { %346 = vlog2.f32 %v154_v1 }
 0x133   :  { %v176_v2 = vpop.xlane.xlu1 %175  ;;  %v157_v3 = vpop.xlane.xlu0 %156 }
 0x134   :  { %348 = vlog2.f32 %v157_v3 }
 0x137   :  { %v179_v4 = vpop.xlane.xlu1 %178 }
 0x13a   :  { %v347_v5 = vpop.eup %346  ;;  %v253_v14 = vpop.xlane.xlu0 %252 }
 0x13b   :  { %v159_v6 = vmul.f32 0.6931472, %v347_v5  ;;  %v250_v7 = vpop.xlane.xlu1 %249  ;;  %v259_v19 = vmul.f32 0.015625, %v253_v14 }
 0x13c   :  { %v258_v12 = vmul.f32 0.015625, %v250_v7 }
 0x13d   :  { %v180_v8 = vsub.f32 %v159_v6, %v176_v2 }
 0x13e   :  { %v349_v9 = vpop.eup %348 }
 0x13f   :  { %v256_v10 = vmul.f32 0.0625, %v180_v8  ;;  %v161_v11 = vmul.f32 0.6931472, %v349_v9 }
 0x141   :  { %v181_v15 = vsub.f32 %v161_v11, %v179_v4  ;;  %v260_v16 = vadd.f32 %v258_v12, %v256_v10 }
 0x143   :  { %v257_v17 = vmul.f32 0.0625, %v181_v15  ;;  %v264_v18 = vadd.f32 %v260_v16, %v254_v13 }
 0x145   :  { %267 = vst.msk [vmem:[#allocation2] sm:$0xff] %vm110_vm11, %v264_v18  ;;  %v261_v21 = vadd.f32 %v259_v19, %v257_v17 }
 0x147   :  { %v265_v22 = vadd.f32 %v261_v21, %v255_v20 }
 0x149   :  { %268 = vst.msk [vmem:[#allocation2 + $0x8] sm:$0xff] %vm110_vm11, %v265_v22 }
 0x14c   :  { %v272_v23 = vld [vmem:[#allocation2] sm:$0xff] }
 0x14d   :  { %v274_v25 = vsel %vm110_vm11, %v272_v23, 0.0 }
 0x150   :  { %v273_v24 = vld [vmem:[#allocation2 + $0x8] sm:$0xff] }
 0x151   :  { %v275_v26 = vsel %vm110_vm11, %v273_v24, 0.0 }
 0x152   :  { %v276_v27 = vadd.f32 %v275_v26, %v274_v25 }
 0x154   :  { %277 = vadd.xlane.f32.xlu1 %v276_v27 }
 0x1e1   :  { %v278_v28 = vpop.xlane.xlu1 %277 }
 0x1e2   :  { %v279_v29 = vrot.slane %v278_v28, 4 }
 0x1e4   :  { %v280_v30 = vadd.f32 %v279_v29, %v278_v28 }
 0x1e6   :  { %v281_v31 = vrot.slane %v280_v30, 2 }
 0x1e8   :  { %v282_v32 = vadd.f32 %v281_v31, %v280_v30 }
 0x1ea   :  { %v283_v33 = vrot.slane %v282_v32, 1 }
 0x1ec   :  { %v284_v34 = vadd.f32 %v283_v33, %v282_v32 }
 0x1ee   :  { %328 = vpush %v284_v34 }
 0x21f   :  { %s329_s29 = spop %328 }
 0x220   :  { %v286_v35 = vstv %s329_s29 }
 0x221   :  { %287 = vst [vmem:[#allocation3] sm:$0xff] %v286_v35 }
 0x222   :  { %361 = shalt.err (!%p358_p4)
}
 0x223   :  { %s362_s7 = scalar_lea.hbm %s459_s4, 128 }
 0x224   :  { %p363_p5 = scmp.ne.s32.totalorder %s459_s4, %s362_s7  ;;  %p366_p6 = scmp.lt.u32.totalorder %s362_s7, %s459_s4 }
 0x226   :  { %p368_p7 = pnand %p366_p6, %p363_p5 }
 0x228   :  { %371 = shalt.err (!%p368_p7)
}
 0x229   :  { %297 = dma.vmem_to_hbm [thread:$0]  %s295_s28, 128, %s459_s4, [#allocation4]  }
 0x22a   :  { %372 = dma.done.wait [#allocation4], 128  }
 0x22b   :  { %373 = vsyncadd [#allocation4], 4294967168 }
 0x22c   :  { %301 = vsyncpa [#allocation4], 1 }

</bundles_post_ra>
